<compile_context>
chip_gen: v5e
topology: v5e:2x2
jax: 0.10.0
libtpu: 0.0.40
codegen_flags: <defaults>
</compile_context>

<pallas_src>
import jax
import jax.numpy as jnp
from jax import lax
from jax.experimental import pallas as pl
from jax.experimental.pallas import tpu as pltpu


# dot_general contracting the LAST dim of both operands: (M, N) x (tm, N) -> (M, tm)
_NT_DIMS = (((1,), (1,)), ((), ()))


def mlp_decoder_kernel(x_ref, w1_ref, b1_ref, w2t_ref, b2_ref, o_ref):
    # x:   (tm, N)  bf16 row tile of the flattened input (streamed)
    # w1:  (M, N)   bf16 hidden weight, torch (out, in) layout     (resident)
    # b1:  (M, 1)   f32                                            (resident)
    # w2t: (M, 2)   f32 output weight, transposed torch layout     (resident)
    # b2:  (2, 1)   f32                                            (resident)
    # o:   (2, tm)  f32 lane-dense output: row 0 = mu, row 1 = log_sigma
    x = x_ref[...]

    # Hidden layer on the MXU: bf16 operands, f32 accumulation -> (M, tm).
    h = lax.dot_general(w1_ref[...], x, _NT_DIMS,
                        preferred_element_type=jnp.float32)
    # Bias + ReLU in f32 on the VPU (keep f32 elementwise: v5e has no bf16 VPU).
    h = jnp.maximum(h + b1_ref[...], 0.0)

    # Second projection (M -> 2) OFF the MXU: as a GEMM its 2-row output would
    # still cost as many MXU passes as the main matmul for ~1.5% of the FLOPs.
    # Do it as VPU broadcast-multiply + sublane (XLU) reduce instead.
    w2t = w2t_ref[...]                                           # (M, 2) f32
    mu = jnp.sum(w2t[:, 0:1] * h, axis=0, keepdims=True)         # (1, tm)
    ls = jnp.sum(w2t[:, 1:2] * h, axis=0, keepdims=True)         # (1, tm)
    o_ref[...] = jnp.concatenate([mu, ls], axis=0) + b2_ref[...]


def mlp_decoder_forward(r, w1, b1, w2, b2, *, tm=2048):
    """Fused MLP decoder forward pass.

    r:  (B, S, N) float32
    w1: (M, N), b1: (M,)   -- torch nn.Linear(N, M) parameter layout
    w2: (2, M), b2: (2,)   -- torch nn.Linear(M, 2) parameter layout
    returns (mu, log_sigma), each torch.squeeze'd from (B, S, 1).
    """
    B, S, N = r.shape
    M = w1.shape[0]
    rows = B * S

    # Only large streamed operand + hidden weight go to the MXU in bf16.
    r2d = r.reshape(rows, N).astype(jnp.bfloat16)

    if rows < 128:
        # Tiny input: pad up to a single aligned 128-row tile (negligible copy).
        rows_k = 128
        r2d = jnp.pad(r2d, ((0, rows_k - rows), (0, 0)))
        tm = 128
    else:
        # Large input: NO host-side padding; Pallas masks the ragged last block.
        # Safe because each output column depends only on its own input row.
        rows_k = rows
        tm = max(128, min(tm, (rows // 128) * 128))
        if rows >= 256:
            # Keep the grid at >= 2 steps so the "parallel" row axis can split
            # across both v7x TensorCores (no-op on single-TC v5e/v6e).
            half = pl.cdiv(pl.cdiv(rows, 2), 128) * 128
            tm = min(tm, max(128, half))
    grid_m = pl.cdiv(rows_k, tm)

    w1_b = w1.astype(jnp.bfloat16)                   # (M, N)
    b1_c = b1.reshape(M, 1).astype(jnp.float32)
    w2_t = jnp.transpose(w2).astype(jnp.float32)     # (M, 2)
    b2_c = b2.reshape(2, 1).astype(jnp.float32)

    flops = 2 * rows_k * M * (N + 2)
    bytes_accessed = (2 * rows_k * N              # bf16 input stream
                      + 2 * M * N                 # bf16 W1
                      + 4 * (M + 2 * M + 2)       # f32 b1, W2^T, b2
                      + 4 * 2 * rows_k)           # f32 output

    out_t = pl.pallas_call(
        mlp_decoder_kernel,
        out_shape=jax.ShapeDtypeStruct((2, rows_k), jnp.float32),
        grid_spec=pltpu.PrefetchScalarGridSpec(
            num_scalar_prefetch=0,
            grid=(grid_m,),
            in_specs=[
                # Streamed input row tile.  (pipeline_mode=pl.Buffered(3) only
                # if xprof shows exposed input DMA on v6e; default depth is 2.)
                pl.BlockSpec((tm, N), lambda i: (i, 0)),
                pl.BlockSpec((M, N), lambda i: (0, 0)),    # W1   (resident)
                pl.BlockSpec((M, 1), lambda i: (0, 0)),    # b1   (resident)
                pl.BlockSpec((M, 2), lambda i: (0, 0)),    # W2^T (resident)
                pl.BlockSpec((2, 1), lambda i: (0, 0)),    # b2   (resident)
            ],
            out_specs=pl.BlockSpec((2, tm), lambda i: (0, i)),  # lane-dense out
        ),
        compiler_params=pltpu.CompilerParams(
            dimension_semantics=("parallel",),         # row axis -> megacore (v7x)
            vmem_limit_bytes=32 * 1024 * 1024,         # real footprint << 32 MiB
        ),
        cost_estimate=pl.CostEstimate(
            flops=flops, transcendentals=0, bytes_accessed=bytes_accessed),
    )(r2d, w1_b, b1_c, w2_t, b2_c)

    out = out_t[:, :rows]                          # drop masked/padded columns
    mu = jnp.squeeze(out[0].reshape(B, S))         # torch.squeeze semantics
    log_sigma = jnp.squeeze(out[1].reshape(B, S))
    return mu, log_sigma


def init_params(key, N, M):
    # Deterministic init mimicking nn.Linear's uniform(-1/sqrt(fan_in), ...),
    # stored in torch (out, in) layout.
    k1, k2, k3, k4 = jax.random.split(key, 4)
    lim1 = float(N) ** -0.5
    lim2 = float(M) ** -0.5
    w1 = jax.random.uniform(k1, (M, N), jnp.float32, -lim1, lim1)
    b1 = jax.random.uniform(k2, (M,), jnp.float32, -lim1, lim1)
    w2 = jax.random.uniform(k3, (2, M), jnp.float32, -lim2, lim2)
    b2 = jax.random.uniform(k4, (2,), jnp.float32, -lim2, lim2)
    return w1, b1, w2, b2


def reference(r, w1, b1, w2, b2):
    # Plain-JAX f32 reference: same math as the PyTorch module's forward().
    B, S, N = r.shape
    h = jnp.maximum(r.reshape(-1, N) @ w1.T + b1[None, :], 0.0)
    o = (h @ w2.T + b2[None, :]).reshape(B, S, 2)
    return jnp.squeeze(o[:, :, 0:1]), jnp.squeeze(o[:, :, 1:2])


if __name__ == "__main__":
    key = jax.random.PRNGKey(0)
    kr, kp, kr2 = jax.random.split(key, 3)

    # Case 1: small, MXU/lane-friendly sizes (batch=2, seq=8, N=128, M=256).
    B, S, N, M = 2, 8, 128, 256
    r = jax.random.normal(kr, (B, S, N), jnp.float32)
    w1, b1, w2, b2 = init_params(kp, N, M)

    mu, log_sigma = mlp_decoder_forward(r, w1, b1, w2, b2)
    jax.block_until_ready((mu, log_sigma))

    mu_ref, ls_ref = reference(r, w1, b1, w2, b2)
    assert mu.shape == (B, S) and log_sigma.shape == (B, S)
    # bf16 MXU operands -> loosened tolerance vs. the pure-f32 reference.
    assert jnp.allclose(mu, mu_ref, atol=1e-2, rtol=1e-2), "mu mismatch"
    assert jnp.allclose(log_sigma, ls_ref, atol=1e-2, rtol=1e-2), "log_sigma mismatch"

    # Case 2: ragged row count (rows=300 -> grid=2, masked last block, no pad).
    B2, S2 = 3, 100
    r2 = jax.random.normal(kr2, (B2, S2, N), jnp.float32)
    mu2, ls2 = mlp_decoder_forward(r2, w1, b1, w2, b2)
    jax.block_until_ready((mu2, ls2))
    mu2_ref, ls2_ref = reference(r2, w1, b1, w2, b2)
    assert mu2.shape == (B2, S2) and ls2.shape == (B2, S2)
    assert jnp.allclose(mu2, mu2_ref, atol=1e-2, rtol=1e-2), "ragged mu mismatch"
    assert jnp.allclose(ls2, ls2_ref, atol=1e-2, rtol=1e-2), "ragged log_sigma mismatch"

    # TODO(synk): MLPDecoder.sample (torch.distributions Normal sampling) is not
    # part of forward() and is not implemented here.
    print("KERNEL_OK")
</pallas_src>

<mosaic_0001>
module attributes {stable_mosaic.version = 11 : i64} {
  func.func @mlp_decoder_kernel(%arg0: i32, %arg1: memref<128x128xbf16, #tpu.memory_space<vmem>>, %arg2: memref<256x128xbf16, #tpu.memory_space<vmem>>, %arg3: memref<256x1xf32, #tpu.memory_space<vmem>>, %arg4: memref<256x2xf32, #tpu.memory_space<vmem>>, %arg5: memref<2x1xf32, #tpu.memory_space<vmem>>, %arg6: memref<2x128xf32, #tpu.memory_space<vmem>>) attributes {dimension_semantics = [#tpu.dimension_semantics<parallel>], iteration_bounds = array<i64: 1>, scalar_prefetch = 0 : i64, scratch_operands = 0 : i64, tpu.core_type = #tpu.core_type<tc>, window_params = [{transform_indices = @transform_0, window_bounds = array<i64: 128, 128>}, {pipeline_mode = #tpu.pipeline_mode<synchronous>, transform_indices = @transform_1, window_bounds = array<i64: 256, 128>}, {pipeline_mode = #tpu.pipeline_mode<synchronous>, transform_indices = @transform_2, window_bounds = array<i64: 256, 1>}, {pipeline_mode = #tpu.pipeline_mode<synchronous>, transform_indices = @transform_3, window_bounds = array<i64: 256, 2>}, {pipeline_mode = #tpu.pipeline_mode<synchronous>, transform_indices = @transform_4, window_bounds = array<i64: 2, 1>}, {transform_indices = @transform_5, window_bounds = array<i64: 2, 128>}]} {
    %c0 = arith.constant 0 : index
    %c0_0 = arith.constant 0 : index
    %0 = vector.load %arg1[%c0, %c0_0] : memref<128x128xbf16, #tpu.memory_space<vmem>>, vector<128x128xbf16>
    %c0_1 = arith.constant 0 : index
    %c0_2 = arith.constant 0 : index
    %1 = vector.load %arg2[%c0_1, %c0_2] : memref<256x128xbf16, #tpu.memory_space<vmem>>, vector<256x128xbf16>
    %cst = arith.constant dense<0.000000e+00> : vector<256x128xf32>
    %2 = tpu.matmul %1, %0, %cst {dimension_numbers = #tpu.dot_dimension_numbers<[1], [1], [0], [0], [0, 0, 1, 0], [], []>} : vector<256x128xbf16>, vector<128x128xbf16>, vector<256x128xf32> -> vector<256x128xf32>
    %c0_3 = arith.constant 0 : index
    %c0_4 = arith.constant 0 : index
    %3 = vector.load %arg3[%c0_3, %c0_4] : memref<256x1xf32, #tpu.memory_space<vmem>>, vector<256x1xf32>
    %4 = vector.broadcast %3 : vector<256x1xf32> to vector<256x128xf32>
    %5 = arith.addf %2, %4 : vector<256x128xf32>
    %cst_5 = arith.constant 0.000000e+00 : f32
    %6 = vector.broadcast %cst_5 : f32 to vector<256x128xf32>
    %7 = arith.maximumf %5, %6 : vector<256x128xf32>
    %c0_6 = arith.constant 0 : index
    %c0_7 = arith.constant 0 : index
    %8 = vector.load %arg4[%c0_6, %c0_7] : memref<256x2xf32, #tpu.memory_space<vmem>>, vector<256x2xf32>
    %9 = vector.extract_strided_slice %8 {offsets = [0, 0], sizes = [256, 1], strides = [1, 1]} : vector<256x2xf32> to vector<256x1xf32>
    %10 = vector.broadcast %9 : vector<256x1xf32> to vector<256x128xf32>
    %11 = arith.mulf %10, %7 : vector<256x128xf32>
    %cst_8 = arith.constant dense<0.000000e+00> : vector<128xf32>
    %12 = vector.multi_reduction <add>, %11, %cst_8 [0] : vector<256x128xf32> to vector<128xf32>
    %13 = vector.shape_cast %12 : vector<128xf32> to vector<1x128xf32>
    %14 = vector.extract_strided_slice %8 {offsets = [0, 1], sizes = [256, 1], strides = [1, 1]} : vector<256x2xf32> to vector<256x1xf32>
    %15 = vector.broadcast %14 : vector<256x1xf32> to vector<256x128xf32>
    %16 = arith.mulf %15, %7 : vector<256x128xf32>
    %cst_9 = arith.constant dense<0.000000e+00> : vector<128xf32>
    %17 = vector.multi_reduction <add>, %16, %cst_9 [0] : vector<256x128xf32> to vector<128xf32>
    %18 = vector.shape_cast %17 : vector<128xf32> to vector<1x128xf32>
    %19 = tpu.concatenate %13, %18 in 0 : vector<1x128xf32>, vector<1x128xf32> -> vector<2x128xf32>
    %c0_10 = arith.constant 0 : index
    %c0_11 = arith.constant 0 : index
    %20 = vector.load %arg5[%c0_10, %c0_11] : memref<2x1xf32, #tpu.memory_space<vmem>>, vector<2x1xf32>
    %21 = vector.broadcast %20 : vector<2x1xf32> to vector<2x128xf32>
    %22 = arith.addf %19, %21 : vector<2x128xf32>
    %c0_12 = arith.constant 0 : index
    %c0_13 = arith.constant 0 : index
    %23 = vector.load %arg6[%c0_12, %c0_13] : memref<2x128xf32, #tpu.memory_space<vmem>>, vector<2x128xf32>
    tpu.vector_store %arg6[%c0_12, %c0_13], %22 {strides = array<i32>} : memref<2x128xf32, #tpu.memory_space<vmem>>, vector<2x128xf32>,
    return
  }
  func.func @transform_0(%arg0: i32) -> (i32, i32) {
    %c0_i32 = arith.constant 0 : i32
    %c0_i32_0 = arith.constant 0 : i32
    return %arg0, %c0_i32 : i32, i32
  }
  func.func @transform_1(%arg0: i32) -> (i32, i32) {
    %c0_i32 = arith.constant 0 : i32
    %c0_i32_0 = arith.constant 0 : i32
    %c0_i32_1 = arith.constant 0 : i32
    return %c0_i32, %c0_i32_0 : i32, i32
  }
  func.func @transform_2(%arg0: i32) -> (i32, i32) {
    %c0_i32 = arith.constant 0 : i32
    %c0_i32_0 = arith.constant 0 : i32
    %c0_i32_1 = arith.constant 0 : i32
    return %c0_i32, %c0_i32_0 : i32, i32
  }
  func.func @transform_3(%arg0: i32) -> (i32, i32) {
    %c0_i32 = arith.constant 0 : i32
    %c0_i32_0 = arith.constant 0 : i32
    %c0_i32_1 = arith.constant 0 : i32
    return %c0_i32, %c0_i32_0 : i32, i32
  }
  func.func @transform_4(%arg0: i32) -> (i32, i32) {
    %c0_i32 = arith.constant 0 : i32
    %c0_i32_0 = arith.constant 0 : i32
    %c0_i32_1 = arith.constant 0 : i32
    return %c0_i32, %c0_i32_0 : i32, i32
  }
  func.func @transform_5(%arg0: i32) -> (i32, i32) {
    %c0_i32 = arith.constant 0 : i32
    %c0_i32_0 = arith.constant 0 : i32
    return %c0_i32, %arg0 : i32, i32
  }
}

</mosaic_0001>

<bundles_post_ra>
// kernel: tpu_custom_call.1
= control target key start
LH: loop header
LB: loop body
LE: loop exit
PB: predicated region body
PF: predicated region fallthrough
CT: control target
= control target key end

     0   :  { %v2047_v3 = vmov 0   ;;  %s2041_s0 = inlined_call_operand.vmem [shape: bf16[128,128], index: 0, kind: input, shape index: {}]   ;;  %s2042_s1 = inlined_call_operand.vmem [shape: bf16[256,128], index: 1, kind: input, shape index: {}]   ;;  %s2043_s2 = inlined_call_operand.vmem [shape: f32[256,1], index: 2, kind: input, shape index: {}]   ;;  %s2044_s3 = inlined_call_operand.vmem [shape: f32[256,2], index: 3, kind: input, shape index: {}]   ;;  %s2045_s4 = inlined_call_operand.vmem [shape: f32[2,1], index: 4, kind: input, shape index: {}]   ;;  %s2046_s5 = inlined_call_operand.hbm [shape: f32[2,128], index: 5, kind: output, shape index: {}]  }
   0x1   :  { %v73_v0 = vld [vmem:[%s2043_s2 + $0x20] sm:$0xff]  ;;  %v71_v1 = vld [vmem:[%s2043_s2 + $0x10] sm:$0xff]  ;;  %1159 = vset.pattern.permute.xlu2 %v2047_v3  ;;  %1158 = vset.pattern.permute.xlu1 %v2047_v3  ;;  %v1113_v4 = vld [vmem:[%s2041_s0 + $0x38] sm:$0xff] }
   0x2   :  { %v69_v2 = vld [vmem:[%s2043_s2] sm:$0xff]  ;;  %1157 = vset.pattern.permute.xlu0 %v2047_v3  ;;  %123 = vperm.xlu2 %1159, %v73_v0   ;;  %v74_v5 = vld [vmem:[%s2043_s2 + $0x28] sm:$0xff] }
   0x3   :  { %113 = vperm.xlu1 %1158, %v71_v1   ;;  %103 = vperm.xlu0 %1157, %v69_v2  }
   0x4   :  { %405 = vmatpush.bf16.xpose.msra.mxu0 %v1113_v4  ;;  %1130 = vmatpush.bf16.xpose.msra.mxu1 %v1113_v4 }
   0x5   :  { %1131 = vmatpush.bf16.xpose.msra.mxu2 %v1113_v4  ;;  %1132 = vmatpush.bf16.xpose.msra.mxu3 %v1113_v4 }
   0x6   :  { %10 = vsyncpa [#allocation3], 0  ;;  %v72_v6 = vld [vmem:[%s2043_s2 + $0x18] sm:$0xff]  ;;  %v70_v7 = vld [vmem:[%s2043_s2 + $0x8] sm:$0xff]  ;;  %vm984_vm0 = vcmask 1040384   ;;  %s1001_s13 = sshll.u32 %s2046_s5, 4  ;;  %s1002_s13 = int_to_ptr.hbm [resolvable:$true] %s1001_s13 }
   0x7   :  { %v1112_v8 = vld [vmem:[%s2041_s0 + $0x30] sm:$0xff]  ;;  %v77_v9 = vld [vmem:[%s2043_s2 + $0x40] sm:$0xff]  ;;  %v76_v10 = vld [vmem:[%s2043_s2 + $0x38] sm:$0xff] }
   0x8   :  { %v75_v11 = vld [vmem:[%s2043_s2 + $0x30] sm:$0xff]  ;;  %v1111_v12 = vld [vmem:[%s2041_s0 + $0x28] sm:$0xff]  ;;  %v80_v13 = vld [vmem:[%s2043_s2 + $0x58] sm:$0xff] }
   0x9   :  { %v79_v14 = vld [vmem:[%s2043_s2 + $0x50] sm:$0xff]  ;;  %v78_v15 = vld [vmem:[%s2043_s2 + $0x48] sm:$0xff]  ;;  %v1110_v16 = vld [vmem:[%s2041_s0 + $0x20] sm:$0xff] }
   0xa   :  { %128 = vperm.xlu2 %1159, %v74_v5   ;;  %v83_v17 = vld [vmem:[%s2043_s2 + $0x70] sm:$0xff]  ;;  %v82_v18 = vld [vmem:[%s2043_s2 + $0x68] sm:$0xff]  ;;  %v81_v19 = vld [vmem:[%s2043_s2 + $0x60] sm:$0xff] }
   0xb   :  { %118 = vperm.xlu1 %1158, %v72_v6   ;;  %108 = vperm.xlu0 %1157, %v70_v7   ;;  %v1109_v20 = vld [vmem:[%s2041_s0 + $0x18] sm:$0xff]  ;;  %v86_v21 = vld [vmem:[%s2043_s2 + $0x88] sm:$0xff]  ;;  %v85_v22 = vld [vmem:[%s2043_s2 + $0x80] sm:$0xff] }
   0xc   :  { %406 = vmatpush.bf16.xpose.msra.mxu0 %v1112_v8  ;;  %1133 = vmatpush.bf16.xpose.msra.mxu1 %v1112_v8  ;;  %v84_v23 = vld [vmem:[%s2043_s2 + $0x78] sm:$0xff]  ;;  %v1108_v24 = vld [vmem:[%s2041_s0 + $0x10] sm:$0xff]  ;;  %v89_v25 = vld [vmem:[%s2043_s2 + $0xa0] sm:$0xff] }
   0xd   :  { %1134 = vmatpush.bf16.xpose.msra.mxu2 %v1112_v8  ;;  %1135 = vmatpush.bf16.xpose.msra.mxu3 %v1112_v8  ;;  %v88_v26 = vld [vmem:[%s2043_s2 + $0x98] sm:$0xff]  ;;  %v87_v27 = vld [vmem:[%s2043_s2 + $0x90] sm:$0xff]  ;;  %v1107_v28 = vld [vmem:[%s2041_s0 + $0x8] sm:$0xff] }
   0xe   :  { %v92_v29 = vld [vmem:[%s2043_s2 + $0xb8] sm:$0xff]  ;;  %v91_v30 = vld [vmem:[%s2043_s2 + $0xb0] sm:$0xff]  ;;  %v90_v31 = vld [vmem:[%s2043_s2 + $0xa8] sm:$0xff] }
   0xf   :  { %v1106_v32 = vld [vmem:[%s2041_s0] sm:$0xff]  ;;  %v95_v33 = vld [vmem:[%s2043_s2 + $0xd0] sm:$0xff]  ;;  %v94_v34 = vld [vmem:[%s2043_s2 + $0xc8] sm:$0xff] }
  0x10   :  { %v93_v35 = vld [vmem:[%s2043_s2 + $0xc0] sm:$0xff]  ;;  %v98_v40 = vld [vmem:[%s2043_s2 + $0xe8] sm:$0xff]  ;;  %v96_v42 = vld [vmem:[%s2043_s2 + $0xd8] sm:$0xff] }
  0x11   :  { %v1114_v36 = vld [vmem:[%s2042_s1] sm:$0xff]  ;;  %v100_v44 = vld [vmem:[%s2043_s2 + $0xf8] sm:$0xff]  ;;  %v99_v45 = vld [vmem:[%s2043_s2 + $0xf0] sm:$0xff] }
  0x12   :  { %143 = vperm.xlu2 %1159, %v77_v9   ;;  %v1118_v37 = vld [vmem:[%s2042_s1 + $0x20] sm:$0xff]  ;;  %v1115_v46 = vld [vmem:[%s2042_s1 + $0x8] sm:$0xff]  ;;  %v1380_v50 = vld [vmem:[%s2044_s3 + $0x18] sm:$0xff] }
  0x13   :  { %138 = vperm.xlu1 %1158, %v76_v10   ;;  %133 = vperm.xlu0 %1157, %v75_v11   ;;  %v1122_v38 = vld [vmem:[%s2042_s1 + $0x40] sm:$0xff]  ;;  %v1119_v47 = vld [vmem:[%s2042_s1 + $0x28] sm:$0xff]  ;;  %v1385_v51 = vld [vmem:[%s2044_s3 + $0x10] sm:$0xff] }
  0x14   :  { %407 = vmatpush.bf16.xpose.msra.mxu0 %v1111_v12  ;;  %1136 = vmatpush.bf16.xpose.msra.mxu1 %v1111_v12  ;;  %v1126_v39 = vld [vmem:[%s2042_s1 + $0x60] sm:$0xff]  ;;  %v1123_v48 = vld [vmem:[%s2042_s1 + $0x48] sm:$0xff]  ;;  %v1400_v54 = vld [vmem:[%s2044_s3 + $0x30] sm:$0xff] }
  0x15   :  { %1137 = vmatpush.bf16.xpose.msra.mxu2 %v1111_v12  ;;  %1138 = vmatpush.bf16.xpose.msra.mxu3 %v1111_v12  ;;  %v97_v41 = vld [vmem:[%s2043_s2 + $0xe0] sm:$0xff]  ;;  %v1127_v49 = vld [vmem:[%s2042_s1 + $0x68] sm:$0xff]  ;;  %v1116_v57 = vld [vmem:[%s2042_s1 + $0x10] sm:$0xff] }
  0x16   :  { %v1356_v43 = vld [vmem:[%s2044_s3] sm:$0xff]  ;;  %v1390_v52 = vld [vmem:[%s2044_s3 + $0x8] sm:$0xff]  ;;  %v1120_v58 = vld [vmem:[%s2042_s1 + $0x30] sm:$0xff] }
  0x17   :  { %v1405_v55 = vld [vmem:[%s2044_s3 + $0x28] sm:$0xff]  ;;  %v1410_v56 = vld [vmem:[%s2044_s3 + $0x20] sm:$0xff]  ;;  %v1124_v59 = vld [vmem:[%s2042_s1 + $0x50] sm:$0xff] }
  0x18   :  { %v1128_v60 = vld [vmem:[%s2042_s1 + $0x70] sm:$0xff]  ;;  %v1432_v62 = vld [vmem:[%s2044_s3 + $0x48] sm:$0xff]  ;;  %v1437_v63 = vld [vmem:[%s2044_s3 + $0x40] sm:$0xff] }
  0x19   :  { %v1442_v0 = vld [vmem:[%s2044_s3 + $0x38] sm:$0xff]  ;;  %v1452_v2 = vld [vmem:[%s2044_s3 + $0x60] sm:$0xff]  ;;  %v1462_v5 = vld [vmem:[%s2044_s3 + $0x50] sm:$0xff] }
  0x1a   :  { %158 = vperm.xlu2 %1159, %v80_v13   ;;  %v1457_v4 = vld [vmem:[%s2044_s3 + $0x58] sm:$0xff] }
  0x1b   :  { %153 = vperm.xlu1 %1158, %v79_v14   ;;  %148 = vperm.xlu0 %1157, %v78_v15   ;;  %v1117_v6 = vld [vmem:[%s2042_s1 + $0x18] sm:$0xff]  ;;  %v1493_v14 = vld [vmem:[%s2044_s3 + $0x70] sm:$0xff]  ;;  %v1498_v15 = vld [vmem:[%s2044_s3 + $0x68] sm:$0xff] }
  0x1c   :  { %408 = vmatpush.bf16.xpose.msra.mxu0 %v1110_v16  ;;  %1139 = vmatpush.bf16.xpose.msra.mxu1 %v1110_v16  ;;  %v1121_v7 = vld [vmem:[%s2042_s1 + $0x38] sm:$0xff] }
  0x1d   :  { %1140 = vmatpush.bf16.xpose.msra.mxu2 %v1110_v16  ;;  %1141 = vmatpush.bf16.xpose.msra.mxu3 %v1110_v16  ;;  %v1125_v8 = vld [vmem:[%s2042_s1 + $0x58] sm:$0xff] }
  0x1e   :  { %v1129_v9 = vld [vmem:[%s2042_s1 + $0x78] sm:$0xff] }
  0x1f   :  { %v1488_v13 = vld [vmem:[%s2044_s3 + $0x78] sm:$0xff] }
  0x22   :  { %173 = vperm.xlu2 %1159, %v83_v17  }
  0x23   :  { %168 = vperm.xlu1 %1158, %v82_v18   ;;  %163 = vperm.xlu0 %1157, %v81_v19   ;;  %v1512_v19 = vld [vmem:[%s2044_s3 + $0x90] sm:$0xff] }
  0x24   :  { %409 = vmatpush.bf16.xpose.msra.mxu0 %v1109_v20  ;;  %1142 = vmatpush.bf16.xpose.msra.mxu1 %v1109_v20 }
  0x25   :  { %1143 = vmatpush.bf16.xpose.msra.mxu2 %v1109_v20  ;;  %1144 = vmatpush.bf16.xpose.msra.mxu3 %v1109_v20  ;;  %v1517_v20 = vld [vmem:[%s2044_s3 + $0x88] sm:$0xff] }
  0x2a   :  { %188 = vperm.xlu2 %1159, %v86_v21   ;;  %v1522_v21 = vld [vmem:[%s2044_s3 + $0x80] sm:$0xff] }
  0x2b   :  { %183 = vperm.xlu1 %1158, %v85_v22   ;;  %178 = vperm.xlu0 %1157, %v84_v23  }
  0x2c   :  { %410 = vmatpush.bf16.xpose.msra.mxu0 %v1108_v24  ;;  %1145 = vmatpush.bf16.xpose.msra.mxu1 %v1108_v24 }
  0x2d   :  { %1146 = vmatpush.bf16.xpose.msra.mxu2 %v1108_v24  ;;  %1147 = vmatpush.bf16.xpose.msra.mxu3 %v1108_v24 }
  0x32   :  { %203 = vperm.xlu2 %1159, %v89_v25   ;;  %v1536_v25 = vld [vmem:[%s2044_s3 + $0xa8] sm:$0xff] }
  0x33   :  { %198 = vperm.xlu1 %1158, %v88_v26   ;;  %193 = vperm.xlu0 %1157, %v87_v27   ;;  %v1541_v26 = vld [vmem:[%s2044_s3 + $0xa0] sm:$0xff]  ;;  %v1546_v27 = vld [vmem:[%s2044_s3 + $0x98] sm:$0xff] }
  0x34   :  { %411 = vmatpush.bf16.xpose.msra.mxu0 %v1107_v28  ;;  %1148 = vmatpush.bf16.xpose.msra.mxu1 %v1107_v28 }
  0x35   :  { %1149 = vmatpush.bf16.xpose.msra.mxu2 %v1107_v28  ;;  %1150 = vmatpush.bf16.xpose.msra.mxu3 %v1107_v28 }
  0x3a   :  { %218 = vperm.xlu2 %1159, %v92_v29  }
  0x3b   :  { %213 = vperm.xlu1 %1158, %v91_v30   ;;  %208 = vperm.xlu0 %1157, %v90_v31   ;;  %v1560_v31 = vld [vmem:[%s2044_s3 + $0xc0] sm:$0xff] }
  0x3c   :  { %412 = vmatpush.bf16.xpose.msra.mxu0 %v1106_v32  ;;  %1151 = vmatpush.bf16.xpose.msra.mxu1 %v1106_v32 }
  0x3d   :  { %1152 = vmatpush.bf16.xpose.msra.mxu2 %v1106_v32  ;;  %1153 = vmatpush.bf16.xpose.msra.mxu3 %v1106_v32  ;;  %v1565_v32 = vld [vmem:[%s2044_s3 + $0xb8] sm:$0xff] }
  0x42   :  { %233 = vperm.xlu2 %1159, %v95_v33   ;;  %v1570_v33 = vld [vmem:[%s2044_s3 + $0xb0] sm:$0xff] }
  0x43   :  { %228 = vperm.xlu1 %1158, %v94_v34   ;;  %223 = vperm.xlu0 %1157, %v93_v35  }
  0x44   :  { %413 = vmatmul.bf16.vlgmr.msra.gmra.mxu0 %v1114_v36  ;;  %433 = vmatmul.bf16.vlgmr.msra.gmra.mxu1 %v1118_v37  ;;  %v1584_v37 = vld [vmem:[%s2044_s3 + $0xd8] sm:$0xff] }
  0x45   :  { %453 = vmatmul.bf16.vlgmr.msra.gmra.mxu2 %v1122_v38  ;;  %473 = vmatmul.bf16.vlgmr.msra.gmra.mxu3 %v1126_v39  ;;  %v1589_v38 = vld [vmem:[%s2044_s3 + $0xd0] sm:$0xff]  ;;  %v1594_v39 = vld [vmem:[%s2044_s3 + $0xc8] sm:$0xff] }
  0x4a   :  { %248 = vperm.xlu2 %1159, %v98_v40  }
  0x4b   :  { %243 = vperm.xlu1 %1158, %v97_v41   ;;  %238 = vperm.xlu0 %1157, %v96_v42  }
  0x52   :  { %560 = vperm.xlu2 %1159, %v1356_v43  }
  0x53   :  { %258 = vperm.xlu1 %1158, %v100_v44   ;;  %253 = vperm.xlu0 %1157, %v99_v45   ;;  %v1608_v44 = vld [vmem:[%s2044_s3 + $0xf0] sm:$0xff]  ;;  %v1613_v45 = vld [vmem:[%s2044_s3 + $0xe8] sm:$0xff] }
  0x54   :  { %418 = vmatmul.bf16.gmra.mxu0 %v1115_v46  ;;  %438 = vmatmul.bf16.gmra.mxu1 %v1119_v47  ;;  %v1618_v46 = vld [vmem:[%s2044_s3 + $0xe0] sm:$0xff] }
  0x55   :  { %458 = vmatmul.bf16.gmra.mxu2 %v1123_v48  ;;  %478 = vmatmul.bf16.gmra.mxu3 %v1127_v49 }
  0x5a   :  { %575 = vperm.xlu2 %1159, %v1380_v50  }
  0x5b   :  { %570 = vperm.xlu1 %1158, %v1385_v51   ;;  %565 = vperm.xlu0 %1157, %v1390_v52  }
  0x5c   :  { %v1395_v53 = vpop.permute.xlu2 %123 }
  0x62   :  { %590 = vperm.xlu2 %1159, %v1400_v54  }
  0x63   :  { %585 = vperm.xlu1 %1158, %v1405_v55   ;;  %580 = vperm.xlu0 %1157, %v1410_v56  }
  0x64   :  { %423 = vmatmul.bf16.gmra.mxu0 %v1116_v57  ;;  %443 = vmatmul.bf16.gmra.mxu1 %v1120_v58  ;;  %v1427_v61 = vpop.permute.xlu2 %128  ;;  %v1632_v57 = vld [vmem:[%s2044_s3 + $0xf8] sm:$0xff]  ;;  %v1192_v58 = vmov 1  }
  0x65   :  { %463 = vmatmul.bf16.gmra.mxu2 %v1124_v59  ;;  %483 = vmatmul.bf16.gmra.mxu3 %v1128_v60 }
  0x6a   :  { %605 = vperm.xlu2 %1159, %v1432_v62  }
  0x6b   :  { %600 = vperm.xlu1 %1158, %v1437_v63   ;;  %595 = vperm.xlu0 %1157, %v1442_v0  }
  0x6c   :  { %v1447_v1 = vpop.permute.xlu2 %143 }
  0x72   :  { %620 = vperm.xlu2 %1159, %v1452_v2  }
  0x73   :  { %615 = vperm.xlu1 %1158, %v1457_v4   ;;  %610 = vperm.xlu0 %1157, %v1462_v5  }
  0x74   :  { %428 = vmatmul.bf16.gmra.mxu0 %v1117_v6  ;;  %448 = vmatmul.bf16.gmra.mxu1 %v1121_v7  ;;  %v1479_v10 = vpop.permute.xlu2 %158 }
  0x75   :  { %468 = vmatmul.bf16.gmra.mxu2 %v1125_v8  ;;  %488 = vmatmul.bf16.gmra.mxu3 %v1129_v9  ;;  %v1481_v11 = vpop.permute.xlu1 %113  ;;  %v1483_v12 = vpop.permute.xlu0 %103 }
  0x7a   :  { %635 = vperm.xlu2 %1159, %v1488_v13  }
  0x7b   :  { %630 = vperm.xlu1 %1158, %v1493_v14   ;;  %625 = vperm.xlu0 %1157, %v1498_v15  }
  0x7c   :  { %v1503_v16 = vpop.permute.xlu2 %173 }
  0x7d   :  { %v1505_v17 = vpop.permute.xlu1 %118  ;;  %v1507_v18 = vpop.permute.xlu0 %108 }
  0x82   :  { %650 = vperm.xlu2 %1159, %v1512_v19  }
  0x83   :  { %645 = vperm.xlu1 %1158, %v1517_v20   ;;  %640 = vperm.xlu0 %1157, %v1522_v21  }
  0x84   :  { %v1527_v22 = vpop.permute.xlu2 %188 }
  0x85   :  { %2075 = vst [vmem:[#allocation5_spill] sm:$0xff] %v1527_v22  ;;  %v1529_v23 = vpop.permute.xlu1 %138  ;;  %v1531_v24 = vpop.permute.xlu0 %133 }
  0x8a   :  { %665 = vperm.xlu2 %1159, %v1536_v25  }
  0x8b   :  { %660 = vperm.xlu1 %1158, %v1541_v26   ;;  %655 = vperm.xlu0 %1157, %v1546_v27  }
  0x8c   :  { %v1551_v28 = vpop.permute.xlu2 %203 }
  0x8d   :  { %2076 = vst [vmem:[#allocation6_spill] sm:$0xff] %v1551_v28  ;;  %v1553_v29 = vpop.permute.xlu1 %153  ;;  %v1555_v30 = vpop.permute.xlu0 %148 }
  0x92   :  { %680 = vperm.xlu2 %1159, %v1560_v31  }
  0x93   :  { %675 = vperm.xlu1 %1158, %v1565_v32   ;;  %670 = vperm.xlu0 %1157, %v1570_v33  }
  0x94   :  { %v1575_v34 = vpop.permute.xlu2 %218 }
  0x95   :  { %2077 = vst [vmem:[#allocation7_spill] sm:$0xff] %v1575_v34  ;;  %v1577_v35 = vpop.permute.xlu1 %168  ;;  %v1579_v36 = vpop.permute.xlu0 %163 }
  0x9a   :  { %695 = vperm.xlu2 %1159, %v1584_v37  }
  0x9b   :  { %690 = vperm.xlu1 %1158, %v1589_v38   ;;  %685 = vperm.xlu0 %1157, %v1594_v39  }
  0x9c   :  { %v1599_v40 = vpop.permute.xlu2 %233 }
  0x9d   :  { %v1601_v41 = vpop.permute.xlu1 %183  ;;  %v1603_v42 = vpop.permute.xlu0 %178 }
  0xa2   :  { %710 = vperm.xlu2 %1159, %v1608_v44  }
  0xa3   :  { %705 = vperm.xlu1 %1158, %v1613_v45   ;;  %700 = vperm.xlu0 %1157, %v1618_v46  }
  0xa4   :  { %v1623_v47 = vpop.permute.xlu2 %248 }
  0xa5   :  { %2078 = vst [vmem:[#allocation8_spill] sm:$0xff] %v1623_v47  ;;  %v1625_v48 = vpop.permute.xlu1 %198  ;;  %v1627_v49 = vpop.permute.xlu0 %193 }
  0xaa   :  { %1161 = vset.pattern.permute.xlu2 %v1192_v58 }
  0xab   :  { %1160 = vset.pattern.permute.xlu1 %v1192_v58  ;;  %715 = vperm.xlu0 %1157, %v1632_v57  }
  0xac   :  { %792 = vperm.xlu2 %1161, %v1390_v52   ;;  %788 = vperm.xlu1 %1160, %v1356_v43   ;;  %v561_v59 = vpop.permute.xlu2 %560 }
  0xad   :  { %v1637_v60 = vpop.permute.xlu1 %213  ;;  %v1639_v6 = vpop.permute.xlu0 %208 }
  0xae   :  { %2079 = vst [vmem:[#allocation9_spill] sm:$0xff] %v1637_v60 }
  0xb3   :  { %1162 = vset.pattern.permute.xlu0 %v1192_v58 }
  0xb4   :  { %804 = vperm.xlu2 %1161, %v1410_v56   ;;  %800 = vperm.xlu1 %1160, %v1380_v50   ;;  %v1643_v7 = vpop.permute.xlu2 %575 }
  0xb5   :  { %796 = vperm.xlu0 %1162, %v1385_v51   ;;  %v1646_v8 = vpop.permute.xlu1 %228  ;;  %v1648_v9 = vpop.permute.xlu0 %223 }
  0xbc   :  { %812 = vperm.xlu2 %1161, %v1400_v54   ;;  %808 = vperm.xlu1 %1160, %v1405_v55   ;;  %v1652_v43 = vpop.permute.xlu2 %590 }
  0xbd   :  { %816 = vperm.xlu0 %1162, %v1442_v0   ;;  %v1655_v52 = vpop.permute.xlu1 %243  ;;  %v1657_v56 = vpop.permute.xlu0 %238 }
  0xbe   :  { %2080 = vst [vmem:[#allocation10_spill] sm:$0xff] %v1655_v52 }
  0xc1   :  { %v414_v50 = vpop.f32.mrf.mxu0  ;;  %v1659_v58 = vpop.f32.mrf.mxu1 }
  0xc2   :  { %v1669_v0 = vadd.f32 %v414_v50, %v1483_v12 }
  0xc4   :  { %824 = vperm.xlu2 %1161, %v1432_v62   ;;  %820 = vperm.xlu1 %1160, %v1437_v63   ;;  %v606_v51 = vpop.permute.xlu2 %605  ;;  %2082 = vst [vmem:[#allocation12_spill] sm:$0xff] %v1669_v0 }
  0xc5   :  { %828 = vperm.xlu0 %1162, %v1462_v5   ;;  %v1664_v54 = vpop.permute.xlu1 %258  ;;  %v1666_v55 = vpop.permute.xlu0 %253 }
  0xc6   :  { %2081 = vst [vmem:[#allocation11_spill] sm:$0xff] %v1664_v54 }
  0xc8   :  { %v1671_v3 = vpop.f32.mrf.mxu2  ;;  %v1673_v47 = vpop.f32.mrf.mxu3 }
  0xc9   :  { %v416_v34 = vpop.f32.mrf.mxu0  ;;  %v436_v60 = vpop.f32.mrf.mxu1 }
  0xca   :  { %v1677_v63 = vadd.f32 %v416_v34, %v1507_v18  ;;  %v1680_v5 = vadd.f32 %v436_v60, %v1555_v30  ;;  %v2085_v18 = vmax.f32 %v1669_v0, 0.0 }
  0xcc   :  { %2083 = vst [vmem:[#allocation13_spill] sm:$0xff] %v1680_v5  ;;  %v2051_v54 = vmax.f32 %v1677_v63, 0.0  ;;  %v2050_v28 = vmax.f32 %v1680_v5, 0.0  ;;  %836 = vperm.xlu2 %1161, %v1452_v2   ;;  %832 = vperm.xlu1 %1160, %v1457_v4   ;;  %v1686_v12 = vpop.permute.xlu2 %620  ;;  %v718_v34 = vmul.f32 %v561_v59, %v2085_v18 }
  0xcd   :  { %2084 = vst [vmem:[#allocation14_spill] sm:$0xff] %v1686_v12  ;;  %840 = vperm.xlu0 %1162, %v1498_v15   ;;  %v571_v50 = vpop.permute.xlu1 %570  ;;  %v566_v62 = vpop.permute.xlu0 %565 }
  0xce   :  { %v1693_v30 = vmul.f32 %v606_v51, %v2050_v28  ;;  %v719_v60 = vmul.f32 %v566_v62, %v2051_v54 }
  0xd0   :  { %v750_v52 = vadd.f32 %v719_v60, %v718_v34  ;;  %v1697_v2 = vpop.f32.mrf.mxu2  ;;  %v1699_v4 = vpop.f32.mrf.mxu3 }
  0xd1   :  { %v419_v22 = vpop.f32.mrf.mxu0  ;;  %v439_v12 = vpop.f32.mrf.mxu1 }
  0xd2   :  { %v1702_v15 = vadd.f32 %v419_v22, %v1481_v11 }
  0xd4   :  { %v2052_v0 = vmax.f32 %v1702_v15, 0.0  ;;  %848 = vperm.xlu2 %1161, %v1488_v13   ;;  %844 = vperm.xlu1 %1160, %v1493_v14   ;;  %v1707_v59 = vpop.permute.xlu2 %635 }
  0xd5   :  { %852 = vperm.xlu0 %1162, %v1522_v21   ;;  %v586_v51 = vpop.permute.xlu1 %585  ;;  %v581_v62 = vpop.permute.xlu0 %580 }
  0xd6   :  { %v720_v18 = vmul.f32 %v571_v50, %v2052_v0 }
  0xd8   :  { %v751_v34 = vadd.f32 %v750_v52, %v720_v18  ;;  %v459_v60 = vpop.f32.mrf.mxu2  ;;  %v1712_v28 = vpop.f32.mrf.mxu3 }
  0xd9   :  { %v1715_v11 = vadd.f32 %v459_v60, %v1627_v49  ;;  %v421_v22 = vpop.f32.mrf.mxu0  ;;  %v1720_v14 = vpop.f32.mrf.mxu1  ;;  %v1739_v60 = vadd.f32 %v439_v12, %v1553_v29 }
  0xda   :  { %v1718_v13 = vadd.f32 %v421_v22, %v1505_v17 }
  0xdb   :  { %2086 = vst [vmem:[#allocation15_spill] sm:$0xff] %v1715_v11  ;;  %v2053_v21 = vmax.f32 %v1715_v11, 0.0 }
  0xdc   :  { %v2055_v54 = vmax.f32 %v1718_v13, 0.0  ;;  %860 = vperm.xlu2 %1161, %v1512_v19   ;;  %856 = vperm.xlu1 %1160, %v1517_v20   ;;  %v651_v52 = vpop.permute.xlu2 %650 }
  0xdd   :  { %864 = vperm.xlu0 %1162, %v1546_v27   ;;  %v1729_v49 = vmul.f32 %v651_v52, %v2053_v21  ;;  %v1731_v50 = vpop.permute.xlu1 %600  ;;  %v1733_v17 = vpop.permute.xlu0 %595  ;;  %v2057_v52 = vmax.f32 %v1739_v60, 0.0 }
  0xde   :  { %v721_v18 = vmul.f32 %v1643_v7, %v2055_v54 }
  0xe0   :  { %v752_v19 = vadd.f32 %v751_v34, %v721_v18  ;;  %v461_v20 = vpop.f32.mrf.mxu2  ;;  %v481_v22 = vpop.f32.mrf.mxu3  ;;  %v1761_v34 = vadd.f32 %v1673_v47, %v1648_v9 }
  0xe1   :  { %v424_v0 = vpop.f32.mrf.mxu0  ;;  %v1746_v11 = vpop.f32.mrf.mxu1 }
  0xe2   :  { %v1742_v27 = vadd.f32 %v424_v0, %v1395_v53  ;;  %v2058_v5 = vmax.f32 %v1761_v34, 0.0 }
  0xe4   :  { %v2059_v21 = vmax.f32 %v1742_v27, 0.0  ;;  %872 = vperm.xlu2 %1161, %v1536_v25   ;;  %868 = vperm.xlu1 %1160, %v1541_v26   ;;  %v666_v7 = vpop.permute.xlu2 %665 }
  0xe5   :  { %876 = vperm.xlu0 %1162, %v1570_v33   ;;  %v1751_v29 = vpop.permute.xlu1 %615  ;;  %v611_v12 = vpop.permute.xlu0 %610 }
  0xe6   :  { %v722_v53 = vmul.f32 %v581_v62, %v2059_v21  ;;  %v1757_v0 = vmul.f32 %v611_v12, %v2057_v52 }
  0xe8   :  { %v753_v25 = vadd.f32 %v752_v19, %v722_v53  ;;  %v1763_v18 = vpop.f32.mrf.mxu2  ;;  %v1765_v26 = vpop.f32.mrf.mxu3  ;;  %v1786_v53 = vadd.f32 %v481_v22, %v1657_v56 }
  0xe9   :  { %v426_v33 = vpop.f32.mrf.mxu0 }
  0xea   :  { %v1768_v54 = vadd.f32 %v426_v33, %v1427_v61 }
  0xec   :  { %v499_v62 = vmax.f32 %v1768_v54, 0.0  ;;  %884 = vperm.xlu2 %1161, %v1560_v31   ;;  %880 = vperm.xlu1 %1160, %v1565_v32   ;;  %v681_v12 = vpop.permute.xlu2 %680  ;;  %v446_v31 = vpop.f32.mrf.mxu1  ;;  %v1790_v32 = vadd.f32 %v1671_v3, %v1601_v41 }
  0xed   :  { %888 = vperm.xlu0 %1162, %v1594_v39   ;;  %v1777_v47 = vmul.f32 %v681_v12, %v2058_v5  ;;  %v1779_v9 = vpop.permute.xlu1 %630  ;;  %v1781_v19 = vpop.permute.xlu0 %625 }
  0xee   :  { %v723_v61 = vmul.f32 %v586_v51, %v499_v62  ;;  %v2060_v51 = vmax.f32 %v1786_v53, 0.0  ;;  %v2062_v22 = vmax.f32 %v1790_v32, 0.0 }
  0xf0   :  { %v754_v39 = vadd.f32 %v753_v25, %v723_v61  ;;  %v466_v33 = vpop.f32.mrf.mxu2  ;;  %v1792_v52 = vpop.f32.mrf.mxu3 }
  0xf1   :  { %v1795_v12 = vadd.f32 %v466_v33, %v1639_v6  ;;  %v429_v5 = vpop.f32.mrf.mxu0 }
  0xf2   :  { %v1798_v21 = vadd.f32 %v429_v5, %v1531_v24 }
  0xf3   :  { %v2061_v56 = vmax.f32 %v1795_v12, 0.0 }
  0xf4   :  { %v500_v3 = vmax.f32 %v1798_v21, 0.0  ;;  %896 = vperm.xlu2 %1161, %v1584_v37   ;;  %892 = vperm.xlu1 %1160, %v1589_v38   ;;  %v696_v41 = vpop.permute.xlu2 %695  ;;  %v449_v33 = vpop.f32.mrf.mxu1 }
  0xf5   :  { %v1808_v6 = vmul.f32 %v666_v7, %v2061_v56  ;;  %900 = vperm.xlu0 %1162, %v1618_v46   ;;  %v1813_v24 = vmul.f32 %v696_v41, %v2060_v51  ;;  %v1815_v5 = vpop.permute.xlu1 %645  ;;  %v641_v25 = vpop.permute.xlu0 %640  ;;  %v1825_v7 = vadd.f32 %v461_v20, %v1625_v48  ;;  %v1832_v56 = vadd.f32 %v1659_v58, %v1447_v1 }
  0xf6   :  { %v724_v37 = vmul.f32 %v1652_v43, %v500_v3  ;;  %v1822_v38 = vmul.f32 %v641_v25, %v2062_v22 }
  0xf7   :  { %v2064_v22 = vmax.f32 %v1825_v7, 0.0  ;;  %v502_v20 = vmax.f32 %v1832_v56, 0.0 }
  0xf8   :  { %v755_v61 = vadd.f32 %v754_v39, %v724_v37  ;;  %v489_v46 = vpop.f32.mrf.mxu3 }
  0xf9   :  { %v1828_v41 = vadd.f32 %v489_v46, %v1666_v55  ;;  %v431_v51 = vpop.f32.mrf.mxu0 }
  0xfa   :  { %v1835_v43 = vadd.f32 %v431_v51, %v1529_v23  ;;  %v1864_v51 = vadd.f32 %v1746_v11, %v1579_v36  ;;  %v2087_v11 = vmov 0  }
  0xfb   :  { %v2063_v25 = vmax.f32 %v1828_v41, 0.0 }
  0xfc   :  { %v501_v48 = vmax.f32 %v1835_v43, 0.0  ;;  %908 = vperm.xlu2 %1161, %v1608_v44   ;;  %904 = vperm.xlu1 %1160, %v1613_v45   ;;  %v711_v55 = vpop.permute.xlu2 %710  ;;  %v1857_v45 = vadd.f32 %v1720_v14, %v1479_v10  ;;  %v506_v10 = vmax.f32 %v1864_v51, 0.0  ;;  %v1872_v14 = vadd.f32 %v446_v31, %v1577_v35  ;;  %v2088_v31 = vld [vmem:[#allocation14_spill] sm:$0xff] }
  0xfd   :  { %912 = vperm.xlu0 %1162, %v1632_v57   ;;  %v1845_v1 = vmul.f32 %v711_v55, %v2063_v25  ;;  %v1847_v58 = vpop.permute.xlu1 %660  ;;  %v656_v23 = vpop.permute.xlu0 %655  ;;  %v726_v57 = vmul.f32 %v1731_v50, %v502_v20  ;;  %v1875_v50 = vadd.f32 %v449_v33, %v1503_v16  ;;  %v1889_v16 = vadd.f32 %v1699_v4, %v1646_v8 }
  0xfe   :  { %v725_v39 = vmul.f32 %v1733_v17, %v501_v48  ;;  %v737_v44 = vmul.f32 %v656_v23, %v2064_v22  ;;  %v986_v17 = vld [vmem:[%s2045_s4] sm:$0x3]  ;;  %v505_v55 = vmax.f32 %v1857_v45, 0.0  ;;  %v451_v23 = vpop.f32.mrf.mxu1  ;;  %v730_v33 = vmul.f32 %v2088_v31, %v506_v10  ;;  %v2090_v22 = vld [vmem:[#allocation10_spill] sm:$0xff]  ;;  %s1193_s4 = smov [#allocation2]  }
  0xff   :  { %v1885_v35 = vadd.f32 %v451_v23, %v1603_v42  ;;  %s999_s11 = sshll.u32 %s1193_s4, 4  ;;  %s1000_s11 = int_to_ptr.vmem [resolvable:$true] %s999_s11 }
 0x100   :  { %v756_v37 = vadd.f32 %v755_v61, %v725_v39 }
 0x101   :  { %v2068_v8 = vmax.f32 %v1885_v35, 0.0 }
 0x102   :  { %v757_v46 = vadd.f32 %v756_v37, %v726_v57  ;;  %v729_v57 = vmul.f32 %v1751_v29, %v505_v55  ;;  %v2070_v29 = vmax.f32 %v1875_v50, 0.0 }
 0x104   :  { %v758_v36 = vadd.f32 %v757_v46, %v1693_v30  ;;  %1163 = vset.pattern.permute.xlu1 %v2087_v11  ;;  %v1893_v30 = vadd.f32 %v1712_v28, %v1599_v40  ;;  %v2065_v46 = vmax.f32 %v1872_v14, 0.0  ;;  %v2089_v28 = vld [vmem:[#allocation5_spill] sm:$0xff] }
 0x105   :  { %v676_v61 = vpop.permute.xlu1 %675  ;;  %v671_v39 = vpop.permute.xlu0 %670  ;;  %989 = vperm.xlu1 %1163, %v986_v17   ;;  %1164 = vset.pattern.permute.xlu0 %v2087_v11  ;;  %v1906_v40 = vadd.f32 %v1697_v2, %v2089_v28 }
 0x106   :  { %v759_v37 = vadd.f32 %v758_v36, %v1757_v0  ;;  %v469_v17 = vpop.f32.mrf.mxu2  ;;  %v731_v42 = vmul.f32 %v1781_v19, %v2065_v46  ;;  %v793_v23 = vpop.permute.xlu2 %792  ;;  %v2067_v36 = vmax.f32 %v1889_v16, 0.0  ;;  %v2066_v11 = vmax.f32 %v1893_v30, 0.0 }
 0x107   :  { %v733_v19 = vmul.f32 %v1707_v59, %v2068_v8  ;;  %v2069_v28 = vmax.f32 %v1906_v40, 0.0  ;;  %v1923_v46 = vadd.f32 %v1765_v26, %v2090_v22 }
 0x108   :  { %v760_v0 = vadd.f32 %v759_v37, %v729_v57  ;;  %v732_v57 = vmul.f32 %v1779_v9, %v2070_v29 }
 0x109   :  { %v735_v59 = vmul.f32 %v1815_v5, %v2069_v28 }
 0x10a   :  { %v761_v4 = vadd.f32 %v760_v0, %v730_v33 }
 0x10c   :  { %v762_v37 = vadd.f32 %v761_v4, %v731_v42  ;;  %v2091_v42 = vld [vmem:[#allocation6_spill] sm:$0xff] }
 0x10d   :  { %v691_v31 = vpop.permute.xlu1 %690  ;;  %v686_v25 = vpop.permute.xlu0 %685  ;;  %v1927_v4 = vadd.f32 %v1763_v18, %v2091_v42  ;;  %v2093_v42 = vld [vmem:[#allocation7_spill] sm:$0xff] }
 0x10e   :  { %v763_v33 = vadd.f32 %v762_v37, %v732_v57  ;;  %v744_v2 = vmul.f32 %v691_v31, %v2066_v11  ;;  %v743_v0 = vmul.f32 %v686_v25, %v2067_v36  ;;  %v471_v37 = vpop.f32.mrf.mxu2  ;;  %v2071_v25 = vmax.f32 %v1923_v46, 0.0  ;;  %v491_v11 = vpop.f32.mrf.mxu3 }
 0x10f   :  { %v805_v36 = vpop.permute.xlu2 %804  ;;  %v2073_v22 = vmax.f32 %v1927_v4, 0.0 }
 0x110   :  { %v764_v9 = vadd.f32 %v763_v33, %v733_v19  ;;  %v2092_v19 = vld [vmem:[#allocation9_spill] sm:$0xff] }
 0x111   :  { %v1936_v33 = vadd.f32 %v469_v17, %v2092_v19 }
 0x112   :  { %v765_v57 = vadd.f32 %v764_v9, %v1822_v38  ;;  %v738_v38 = vmul.f32 %v1847_v58, %v2073_v22  ;;  %v2098_v22 = vmax.f32 %v1677_v63, 0.0 }
 0x113   :  { %v2072_v29 = vmax.f32 %v1936_v33, 0.0 }
 0x114   :  { %v766_v31 = vadd.f32 %v765_v57, %v735_v59  ;;  %v1945_v59 = vadd.f32 %v471_v37, %v2093_v42  ;;  %v2094_v57 = vld [vmem:[#allocation11_spill] sm:$0xff] }
 0x115   :  { %v706_v8 = vpop.permute.xlu1 %705  ;;  %v701_v26 = vpop.permute.xlu0 %700  ;;  %v1948_v28 = vadd.f32 %v491_v11, %v2094_v57  ;;  %v2095_v57 = vld [vmem:[#allocation8_spill] sm:$0xff] }
 0x116   :  { %v767_v18 = vadd.f32 %v766_v31, %v1729_v49  ;;  %v746_v5 = vmul.f32 %v701_v26, %v2071_v25  ;;  %v2074_v19 = vmax.f32 %v1945_v59, 0.0  ;;  %v740_v31 = vmul.f32 %v671_v39, %v2072_v29  ;;  %v2096_v29 = vld [vmem:[#allocation12_spill] sm:$0xff] }
 0x117   :  { %v525_v49 = vmax.f32 %v1948_v28, 0.0  ;;  %v1963_v25 = vadd.f32 %v1792_v52, %v2095_v57 }
 0x118   :  { %v768_v9 = vadd.f32 %v767_v18, %v737_v44  ;;  %v741_v44 = vmul.f32 %v676_v61, %v2074_v19  ;;  %v813_v18 = vpop.permute.xlu2 %812  ;;  %v916_v61 = vmul.f32 %v793_v23, %v2098_v22 }
 0x11a   :  { %v769_v17 = vadd.f32 %v768_v9, %v738_v38 }
 0x11c   :  { %v770_v26 = vadd.f32 %v769_v17, %v1808_v6  ;;  %v2097_v6 = vmax.f32 %v2096_v29, 0.0 }
 0x11d   :  { %v716_v58 = vpop.permute.xlu0 %715 }
 0x11e   :  { %v771_v37 = vadd.f32 %v770_v26, %v740_v31  ;;  %v749_v11 = vmul.f32 %v716_v58, %v525_v49  ;;  %v789_v42 = vpop.permute.xlu1 %788  ;;  %v523_v58 = vmax.f32 %v1963_v25, 0.0 }
 0x11f   :  { %v915_v17 = vmul.f32 %v789_v42, %v2097_v6  ;;  %v2100_v42 = vmax.f32 %v1718_v13, 0.0  ;;  %v921_v13 = vmul.f32 %v813_v18, %v500_v3 }
 0x120   :  { %v772_v38 = vadd.f32 %v771_v37, %v741_v44  ;;  %v825_v37 = vpop.permute.xlu2 %824 }
 0x122   :  { %v773_v9 = vadd.f32 %v772_v38, %v1777_v47  ;;  %v947_v47 = vadd.f32 %v916_v61, %v915_v17  ;;  %v2099_v38 = vmax.f32 %v1702_v15, 0.0 }
 0x124   :  { %v774_v39 = vadd.f32 %v773_v9, %v743_v0  ;;  %v747_v0 = vmul.f32 %v706_v8, %v523_v58  ;;  %v2101_v9 = vmax.f32 %v1742_v27, 0.0 }
 0x126   :  { %v775_v31 = vadd.f32 %v774_v39, %v744_v2  ;;  %v801_v26 = vpop.permute.xlu1 %800  ;;  %v919_v57 = vmul.f32 %v805_v36, %v2101_v9  ;;  %v2107_v9 = vmax.f32 %v1885_v35, 0.0 }
 0x127   :  { %v797_v19 = vpop.permute.xlu0 %796  ;;  %v918_v63 = vmul.f32 %v801_v26, %v2100_v42 }
 0x128   :  { %v776_v44 = vadd.f32 %v775_v31, %v1813_v24  ;;  %v917_v52 = vmul.f32 %v797_v19, %v2099_v38 }
 0x12a   :  { %v777_v29 = vadd.f32 %v776_v44, %v746_v5  ;;  %v948_v23 = vadd.f32 %v947_v47, %v917_v52  ;;  %v837_v5 = vpop.permute.xlu2 %836  ;;  %v2104_v47 = vmax.f32 %v1739_v60, 0.0 }
 0x12b   :  { %v927_v56 = vmul.f32 %v837_v5, %v506_v10 }
 0x12c   :  { %v778_v2 = vadd.f32 %v777_v29, %v747_v0  ;;  %v949_v22 = vadd.f32 %v948_v23, %v918_v63  ;;  %v2105_v29 = vmax.f32 %v1872_v14, 0.0  ;;  %v2106_v23 = vmax.f32 %v1875_v50, 0.0 }
 0x12d   :  { %v2109_v14 = vmax.f32 %v1906_v40, 0.0 }
 0x12e   :  { %v779_v24 = vadd.f32 %v778_v2, %v1845_v1  ;;  %v809_v39 = vpop.permute.xlu1 %808  ;;  %v950_v19 = vadd.f32 %v949_v22, %v919_v57  ;;  %v2108_v57 = vmax.f32 %v1790_v32, 0.0  ;;  %v2113_v32 = vmax.f32 %v1927_v4, 0.0 }
 0x12f   :  { %v920_v15 = vmul.f32 %v809_v39, %v499_v62  ;;  %v817_v6 = vpop.permute.xlu0 %816  ;;  %v2102_v62 = vld [vmem:[#allocation13_spill] sm:$0xff] }
 0x130   :  { %v1982_v17 = vadd.f32 %v779_v24, %v749_v11  ;;  %v922_v27 = vmul.f32 %v817_v6, %v501_v48  ;;  %v2103_v26 = vmax.f32 %v2102_v62, 0.0  ;;  %v2114_v62 = vmax.f32 %v1795_v12, 0.0 }
 0x131   :  { %v951_v8 = vadd.f32 %v950_v19, %v920_v15 }
 0x132   :  { %v924_v44 = vmul.f32 %v825_v37, %v2103_v26  ;;  %v849_v18 = vpop.permute.xlu2 %848 }
 0x133   :  { %v952_v61 = vadd.f32 %v951_v8, %v921_v13  ;;  %v930_v45 = vmul.f32 %v849_v18, %v2107_v9  ;;  %v2110_v13 = vld [vmem:[#allocation15_spill] sm:$0xff]  ;;  %v781_v9 = vrot.slane %v1982_v17, 4 }
 0x134   :  { %v2111_v8 = vmax.f32 %v2110_v13, 0.0 }
 0x135   :  { %v953_v31 = vadd.f32 %v952_v61, %v922_v27  ;;  %v2112_v61 = vmax.f32 %v1825_v7, 0.0  ;;  %v2116_v7 = vmax.f32 %v1945_v59, 0.0 }
 0x136   :  { %v821_v36 = vpop.permute.xlu1 %820 }
 0x137   :  { %v923_v1 = vmul.f32 %v821_v36, %v502_v20  ;;  %v829_v54 = vpop.permute.xlu0 %828 }
 0x138   :  { %v925_v21 = vmul.f32 %v829_v54, %v2104_v47  ;;  %v2115_v47 = vmax.f32 %v1936_v33, 0.0  ;;  %v2119_v33 = vmax.f32 %v1893_v30, 0.0  ;;  %v782_v30 = vadd.f32 %v781_v9, %v1982_v17 }
 0x139   :  { %v954_v11 = vadd.f32 %v953_v31, %v923_v1 }
 0x13a   :  { %v861_v42 = vpop.permute.xlu2 %860 }
 0x13b   :  { %v955_v3 = vadd.f32 %v954_v11, %v924_v44  ;;  %v933_v50 = vmul.f32 %v861_v42, %v2111_v8 }
 0x13d   :  { %v956_v38 = vadd.f32 %v955_v3, %v925_v21 }
 0x13e   :  { %v833_v52 = vpop.permute.xlu1 %832 }
 0x13f   :  { %v926_v43 = vmul.f32 %v833_v52, %v505_v55  ;;  %v841_v48 = vpop.permute.xlu0 %840 }
 0x140   :  { %v928_v37 = vmul.f32 %v841_v48, %v2105_v29 }
 0x141   :  { %v957_v20 = vadd.f32 %v956_v38, %v926_v43  ;;  %v2117_v43 = vmax.f32 %v1761_v34, 0.0 }
 0x142   :  { %v873_v6 = vpop.permute.xlu2 %872 }
 0x143   :  { %v958_v0 = vadd.f32 %v957_v20, %v927_v56  ;;  %v936_v40 = vmul.f32 %v873_v6, %v2114_v62  ;;  %v2118_v56 = vmax.f32 %v1889_v16, 0.0 }
 0x145   :  { %v959_v60 = vadd.f32 %v958_v0, %v928_v37 }
 0x146   :  { %v845_v63 = vpop.permute.xlu1 %844 }
 0x147   :  { %v929_v2 = vmul.f32 %v845_v63, %v2106_v23  ;;  %v853_v22 = vpop.permute.xlu0 %852 }
 0x148   :  { %v931_v51 = vmul.f32 %v853_v22, %v2108_v57 }
 0x149   :  { %v960_v55 = vadd.f32 %v959_v60, %v929_v2  ;;  %v2120_v60 = vmax.f32 %v1786_v53, 0.0  ;;  %v2121_v2 = vmax.f32 %v1923_v46, 0.0 }
 0x14a   :  { %v885_v44 = vpop.permute.xlu2 %884 }
 0x14b   :  { %v961_v10 = vadd.f32 %v960_v55, %v930_v45  ;;  %v939_v4 = vmul.f32 %v885_v44, %v2117_v43 }
 0x14d   :  { %v962_v24 = vadd.f32 %v961_v10, %v931_v51  ;;  %v2122_v10 = vmax.f32 %v1828_v41, 0.0 }
 0x14e   :  { %v857_v39 = vpop.permute.xlu1 %856 }
 0x14f   :  { %v932_v15 = vmul.f32 %v857_v39, %v2109_v14  ;;  %v865_v19 = vpop.permute.xlu0 %864  ;;  %v783_v14 = vrot.slane %v782_v30, 2 }
 0x150   :  { %v934_v35 = vmul.f32 %v865_v19, %v2112_v61 }
 0x151   :  { %v963_v5 = vadd.f32 %v962_v24, %v932_v15  ;;  %v784_v6 = vadd.f32 %v783_v14, %v782_v30 }
 0x152   :  { %v897_v0 = vpop.permute.xlu2 %896 }
 0x153   :  { %v964_v27 = vadd.f32 %v963_v5, %v933_v50  ;;  %v942_v59 = vmul.f32 %v897_v0, %v2120_v60  ;;  %v785_v25 = vrot.slane %v784_v6, 1 }
 0x155   :  { %v965_v36 = vadd.f32 %v964_v27, %v934_v35  ;;  %v786_v17 = vadd.f32 %v785_v25, %v784_v6 }
 0x156   :  { %v869_v31 = vpop.permute.xlu1 %868 }
 0x157   :  { %v935_v1 = vmul.f32 %v869_v31, %v2113_v32  ;;  %v877_v54 = vpop.permute.xlu0 %876 }
 0x158   :  { %v937_v21 = vmul.f32 %v877_v54, %v2115_v47 }
 0x159   :  { %v966_v26 = vadd.f32 %v965_v36, %v935_v1 }
 0x15a   :  { %v909_v45 = vpop.permute.xlu2 %908 }
 0x15b   :  { %v967_v11 = vadd.f32 %v966_v26, %v936_v40  ;;  %v945_v53 = vmul.f32 %v909_v45, %v2122_v10 }
 0x15d   :  { %v968_v18 = vadd.f32 %v967_v11, %v937_v21 }
 0x15e   :  { %v881_v3 = vpop.permute.xlu1 %880 }
 0x15f   :  { %v938_v38 = vmul.f32 %v881_v3, %v2116_v7  ;;  %v889_v52 = vpop.permute.xlu0 %888 }
 0x160   :  { %v940_v12 = vmul.f32 %v889_v52, %v2118_v56 }
 0x161   :  { %v969_v48 = vadd.f32 %v968_v18, %v938_v38 }
 0x163   :  { %v970_v20 = vadd.f32 %v969_v48, %v939_v4 }
 0x165   :  { %v971_v29 = vadd.f32 %v970_v20, %v940_v12 }
 0x166   :  { %v893_v37 = vpop.permute.xlu1 %892 }
 0x167   :  { %v941_v42 = vmul.f32 %v893_v37, %v2119_v33  ;;  %v901_v63 = vpop.permute.xlu0 %900 }
 0x168   :  { %v943_v34 = vmul.f32 %v901_v63, %v2121_v2 }
 0x169   :  { %v972_v23 = vadd.f32 %v971_v29, %v941_v42 }
 0x16b   :  { %v973_v22 = vadd.f32 %v972_v23, %v942_v59 }
 0x16d   :  { %v974_v16 = vadd.f32 %v973_v22, %v943_v34 }
 0x16e   :  { %v905_v55 = vpop.permute.xlu1 %904 }
 0x16f   :  { %v944_v57 = vmul.f32 %v905_v55, %v523_v58  ;;  %v913_v51 = vpop.permute.xlu0 %912 }
 0x170   :  { %v946_v46 = vmul.f32 %v913_v51, %v525_v49 }
 0x171   :  { %v975_v24 = vadd.f32 %v974_v16, %v944_v57 }
 0x173   :  { %v976_v39 = vadd.f32 %v975_v24, %v945_v53 }
 0x175   :  { %v977_v15 = vadd.f32 %v976_v39, %v946_v46 }
 0x177   :  { %v978_v19 = vrot.slane %v977_v15, 4  ;;  %v990_v5 = vpop.permute.xlu1 %989 }
 0x179   :  { %v979_v13 = vadd.f32 %v978_v19, %v977_v15 }
 0x17b   :  { %v980_v8 = vrot.slane %v979_v13, 2 }
 0x17d   :  { %v981_v50 = vadd.f32 %v980_v8, %v979_v13 }
 0x17f   :  { %v982_v58 = vrot.slane %v981_v50, 1 }
 0x181   :  { %v983_v61 = vadd.f32 %v982_v58, %v981_v50 }
 0x183   :  { %v985_v41 = vsel %vm984_vm0, %v786_v17, %v983_v61 }
 0x184   :  { %v992_v28 = vadd.f32 %v990_v5, %v985_v41 }
 0x186   :  { %993 = vst [vmem:[#allocation2] sm:$0x3] %v992_v28 }
 0x187   :  { %1004 = dma.vmem_to_hbm [thread:$0]  %s1000_s11, 32, %s1002_s13, [#allocation3]  }
 0x188   :  { %1189 = dma.done.wait [#allocation3], 32  }
 0x189   :  { %1190 = vsyncadd [#allocation3], 4294967264 }
 0x18a   :  { %1009 = vsyncpa [#allocation3], 1 }

</bundles_post_ra>
